<compile_context>
chip_gen: v5e
topology: v5e:2x2
jax: 0.10.0
libtpu: 0.0.40
codegen_flags: <defaults>
</compile_context>

<pallas_src>
import numpy as np
import jax
import jax.numpy as jnp
from jax import lax
from jax.experimental import pallas as pl
from jax.experimental.pallas import tpu as pltpu


def _cdiv(a, b):
    return -(-a // b)


def make_conv2d_derivative(der_filter, resol, kernel_size=3,
                           target_block_bytes=2 << 20):
    """Returns fn(x_nchw) -> (N,1,H-k+1,W-k+1) matching Conv2dDerivative.forward."""
    k = int(kernel_size)
    w = np.asarray(der_filter, dtype=np.float64).reshape(k, k)
    taps = [(di, dj, float(w[di, dj]))
            for dj in range(k) for di in range(k)
            if float(w[di, dj]) != 0.0]
    resol_f = float(resol)
    inv_resol = np.float32(1.0 / resol_f) if resol_f != 1.0 else None

    def conv2d_derivative(x_nchw):
        N, C, H, W = x_nchw.shape
        assert C == 1, "Conv2dDerivative uses a single input channel"
        assert H >= k and W >= k, "spatial dims must be >= kernel_size"
        H_out, W_out = H - k + 1, W - k + 1

        # Images per grid step: aim for ~MiB-scale blocks, but keep >= 2 grid
        # steps when possible so both v7x TensorCores get work.
        bytes_per_img = (H * W + H_out * W_out) * 4
        tb = max(1, min(N, target_block_bytes // max(bytes_per_img, 1)))
        if N >= 2:
            tb = min(tb, _cdiv(N, 2))
        steps = _cdiv(N, tb)
        tb = _cdiv(N, steps)          # re-balance block size across steps
        steps = _cdiv(N, tb)          # Pallas masks the (possibly partial) last block

        x = x_nchw.astype(jnp.float32)

        def kernel(x_ref, o_ref):
            # All k*k shifted stencil terms are static slices of the VMEM input
            # block (unaligned lane offsets handled by Mosaic); +/-1 weights are
            # pure add/sub; 1/resol applied once at the end.
            acc = None
            for di, dj, wij in taps:
                term = x_ref[:, :, di:di + H_out, dj:dj + W_out]
                if acc is None:
                    if wij == 1.0:
                        acc = term
                    elif wij == -1.0:
                        acc = -term
                    else:
                        acc = term * np.float32(wij)
                else:
                    if wij == 1.0:
                        acc = acc + term
                    elif wij == -1.0:
                        acc = acc - term
                    else:
                        acc = acc + term * np.float32(wij)
            if acc is None:           # all-zero filter
                acc = jnp.zeros(o_ref.shape, jnp.float32)
            if inv_resol is not None:
                acc = acc * inv_resol
            o_ref[...] = acc.astype(o_ref.dtype)

        in_block_bytes = tb * H * W * 4
        out_block_bytes = tb * H_out * W_out * 4
        # Double-buffered in/out blocks plus temporaries; raised above the
        # 16/32 MiB scoped defaults, clamped to v7x's 64 MiB physical VMEM.
        vmem_limit = int(min(max(4 * (in_block_bytes + out_block_bytes),
                                 32 << 20), 64 << 20))
        # TODO(synk): for single images whose block exceeds the VMEM budget
        # (very large H*W), add H-tiling with a (k-1)-row halo.

        cost = pl.CostEstimate(
            flops=2 * max(len(taps), 1) * N * H_out * W_out,
            transcendentals=0,
            bytes_accessed=N * (H * W + H_out * W_out) * 4)

        return pl.pallas_call(
            kernel,
            out_shape=jax.ShapeDtypeStruct((N, 1, H_out, W_out), jnp.float32),
            grid_spec=pltpu.PrefetchScalarGridSpec(
                num_scalar_prefetch=0,
                grid=(steps,),
                in_specs=[pl.BlockSpec((tb, 1, H, W),
                                       lambda n: (n, 0, 0, 0))],
                out_specs=pl.BlockSpec((tb, 1, H_out, W_out),
                                       lambda n: (n, 0, 0, 0)),
            ),
            compiler_params=pltpu.CompilerParams(
                dimension_semantics=("parallel",),
                vmem_limit_bytes=vmem_limit),
            cost_estimate=cost,
        )(x)

    return conv2d_derivative


def _reference_conv(x_nchw, der_filter, resol, kernel_size=3):
    """Pure-JAX reference (lax conv) for validation."""
    w = jnp.asarray(np.asarray(der_filter, dtype=np.float32).reshape(
        1, 1, kernel_size, kernel_size))
    y = lax.conv_general_dilated(
        x_nchw.astype(jnp.float32), w,
        window_strides=(1, 1), padding="VALID",
        dimension_numbers=("NCHW", "OIHW", "NCHW"))
    return y / resol


if __name__ == "__main__":
    # Deterministic fixed filter (discrete Laplacian), as would be passed to
    # Conv2dDerivative(DerFilter=..., resol=dx**2).
    der_filter = np.array([[[[0.0, 1.0, 0.0],
                             [1.0, -4.0, 1.0],
                             [0.0, 1.0, 0.0]]]], dtype=np.float32)
    dx = 0.1
    resol = dx * dx
    kernel_size = 3

    conv2d_derivative = make_conv2d_derivative(der_filter, resol, kernel_size)

    key = jax.random.PRNGKey(0)

    # Case 1: small canonical shape (N=2, C=1, 16x16).
    k1, k2 = jax.random.split(key)
    x1 = jax.random.normal(k1, (2, 1, 16, 16), dtype=jnp.float32)
    out1 = jax.block_until_ready(conv2d_derivative(x1))
    ref1 = jax.block_until_ready(_reference_conv(x1, der_filter, resol, kernel_size))
    assert out1.shape == (2, 1, 14, 14), out1.shape
    np.testing.assert_allclose(np.asarray(out1), np.asarray(ref1),
                               rtol=1e-5, atol=1e-4)

    # Case 2: non-multiple spatial dims and a partial last batch block
    # (exercises Pallas boundary masking and masked lane stores).
    x2 = jax.random.normal(k2, (5, 1, 33, 47), dtype=jnp.float32)
    out2 = jax.block_until_ready(conv2d_derivative(x2))
    ref2 = jax.block_until_ready(_reference_conv(x2, der_filter, resol, kernel_size))
    assert out2.shape == (5, 1, 31, 45), out2.shape
    np.testing.assert_allclose(np.asarray(out2), np.asarray(ref2),
                               rtol=1e-5, atol=1e-4)

    print("KERNEL_OK")
</pallas_src>

<mosaic_0001>
module attributes {stable_mosaic.version = 11 : i64} {
  func.func @kernel(%arg0: i32, %arg1: memref<1x1x16x16xf32, #tpu.memory_space<vmem>>, %arg2: memref<1x1x14x14xf32, #tpu.memory_space<vmem>>) attributes {dimension_semantics = [#tpu.dimension_semantics<parallel>], iteration_bounds = array<i64: 2>, scalar_prefetch = 0 : i64, scratch_operands = 0 : i64, tpu.core_type = #tpu.core_type<tc>, window_params = [{transform_indices = @transform_0, window_bounds = array<i64: 1, 1, 16, 16>}, {transform_indices = @transform_1, window_bounds = array<i64: 1, 1, 14, 14>}]} {
    %c0 = arith.constant 0 : index
    %c0_0 = arith.constant 0 : index
    %c1 = arith.constant 1 : index
    %c0_1 = arith.constant 0 : index
    %0 = vector.load %arg1[%c0, %c0_0, %c1, %c0_1] : memref<1x1x16x16xf32, #tpu.memory_space<vmem>>, vector<1x1x14x14xf32>
    %c0_2 = arith.constant 0 : index
    %c0_3 = arith.constant 0 : index
    %c0_4 = arith.constant 0 : index
    %c1_5 = arith.constant 1 : index
    %1 = vector.load %arg1[%c0_2, %c0_3, %c0_4, %c1_5] : memref<1x1x16x16xf32, #tpu.memory_space<vmem>>, vector<1x1x14x14xf32>
    %2 = arith.addf %0, %1 : vector<1x1x14x14xf32>
    %c0_6 = arith.constant 0 : index
    %c0_7 = arith.constant 0 : index
    %c1_8 = arith.constant 1 : index
    %c1_9 = arith.constant 1 : index
    %3 = vector.load %arg1[%c0_6, %c0_7, %c1_8, %c1_9] : memref<1x1x16x16xf32, #tpu.memory_space<vmem>>, vector<1x1x14x14xf32>
    %cst = arith.constant -4.000000e+00 : f32
    %4 = vector.broadcast %cst : f32 to vector<1x1x14x14xf32>
    %5 = arith.mulf %3, %4 : vector<1x1x14x14xf32>
    %6 = arith.addf %2, %5 : vector<1x1x14x14xf32>
    %c0_10 = arith.constant 0 : index
    %c0_11 = arith.constant 0 : index
    %c2 = arith.constant 2 : index
    %c1_12 = arith.constant 1 : index
    %7 = vector.load %arg1[%c0_10, %c0_11, %c2, %c1_12] : memref<1x1x16x16xf32, #tpu.memory_space<vmem>>, vector<1x1x14x14xf32>
    %8 = arith.addf %6, %7 : vector<1x1x14x14xf32>
    %c0_13 = arith.constant 0 : index
    %c0_14 = arith.constant 0 : index
    %c1_15 = arith.constant 1 : index
    %c2_16 = arith.constant 2 : index
    %9 = vector.load %arg1[%c0_13, %c0_14, %c1_15, %c2_16] : memref<1x1x16x16xf32, #tpu.memory_space<vmem>>, vector<1x1x14x14xf32>
    %10 = arith.addf %8, %9 : vector<1x1x14x14xf32>
    %cst_17 = arith.constant 1.000000e+02 : f32
    %11 = vector.broadcast %cst_17 : f32 to vector<1x1x14x14xf32>
    %12 = arith.mulf %10, %11 : vector<1x1x14x14xf32>
    %c0_18 = arith.constant 0 : index
    %c0_19 = arith.constant 0 : index
    %c0_20 = arith.constant 0 : index
    %c0_21 = arith.constant 0 : index
    %13 = vector.load %arg2[%c0_18, %c0_19, %c0_20, %c0_21] : memref<1x1x14x14xf32, #tpu.memory_space<vmem>>, vector<1x1x14x14xf32>
    tpu.vector_store %arg2[%c0_18, %c0_19, %c0_20, %c0_21], %12 {strides = array<i32>} : memref<1x1x14x14xf32, #tpu.memory_space<vmem>>, vector<1x1x14x14xf32>,
    return
  }
  func.func @transform_0(%arg0: i32) -> (i32, i32, i32, i32) {
    %c0_i32 = arith.constant 0 : i32
    %c0_i32_0 = arith.constant 0 : i32
    %c0_i32_1 = arith.constant 0 : i32
    %c0_i32_2 = arith.constant 0 : i32
    return %arg0, %c0_i32, %c0_i32_0, %c0_i32_1 : i32, i32, i32, i32
  }
  func.func @transform_1(%arg0: i32) -> (i32, i32, i32, i32) {
    %c0_i32 = arith.constant 0 : i32
    %c0_i32_0 = arith.constant 0 : i32
    %c0_i32_1 = arith.constant 0 : i32
    %c0_i32_2 = arith.constant 0 : i32
    return %arg0, %c0_i32, %c0_i32_0, %c0_i32_1 : i32, i32, i32, i32
  }
}

</mosaic_0001>

<bundles_post_ra>
// kernel: tpu_custom_call.1
= control target key start
LH: loop header
LB: loop body
LE: loop exit
PB: predicated region body
PF: predicated region fallthrough
CT: control target
= control target key end

     0   :  { %6 = vsyncpa [#allocation3], 0  ;;  %s489_s0 = inlined_call_operand.hbm [shape: f32[2,1,16,16], index: 0, kind: input, shape index: {}]   ;;  %s490_s1 = inlined_call_operand.vmem [shape: f32[2,1,14,14], index: 1, kind: output, shape index: {}]  }
   0x1   :  { %8 = vsyncpa [#allocation3 + $0x1], 0  ;;  %s397_s6 = smov 0   ;;  %s399_s7 = smov 0  }
   0x2   :  { %s401_s8 = smov 0   ;;  %s403_s9 = smov 0  }
   0x3 LB: > { %s416_s10 = sadd.s32 4294967295, %s381_s9   ;;  %s419_s11 = sadd.s32 1, %s381_s9   ;;  %s381_s9 = sphi %s403_s9, %s497_s9   ;;  %s377_s8 = sphi %s401_s8, %s496_s8   ;;  %s373_s7 = sphi %s399_s7, %s495_s7   ;;  %s369_s6 = sphi %s397_s6, %s494_s6  }
   0x4   : > { %s18_s12 = ssub.s32 %s381_s9, %s419_s11  ;;  %s21_s13 = sadd.s32 1, %s377_s8 }
   0x5   : > { %p19_p0 = scmp.eq.s32.totalorder %s18_s12, 0  ;;  %p28_p1 = scmp.ne.s32.totalorder %s377_s8, %s373_s7 }
   0x6   : > { %p29_p2 = scmp.eq.s32.totalorder %s381_s9, 0  ;;  %p34_p3 = scmp.ne.s32.totalorder %s373_s7, %s369_s6 }
   0x7   : > { %s429_s14 = scalar_select %p19_p0, %s377_s8, %s21_s13  }
   0x8   : > { %p431_p4 = por %p29_p2, %p28_p1  ;;  %p35_p5 = scmp.eq.s32.totalorder %s416_s10, 0 }
   0x9   : > { %p280_p6 = scmp.lt.s32.totalorder %s381_s9, 2  ;;  %s84_s17 = sand.u32 1, %s377_s8  }
   0xa   : > { %p437_p7 = por %p35_p5, %p34_p3  ;;  %s263_s18 = sshll.u32 %s84_s17, 4 }
   0xb   : > { %s272_s19 = sshll.u32 %s381_s9, 4  ;;  %s88_s23 = scalar_lea.vmem [#allocation2], %s263_s18 }
   0xc   : > { %s93_s22 = scalar_lea.hbm %s489_s0, %s272_s19  ;;  %s96_s24 = sshll.u32 %s88_s23, 4  ;;  %s97_s24 = int_to_ptr.vmem [resolvable:$true] %s96_s24 }
   0xd   : > { %s94_s25 = sshll.u32 %s93_s22, 4  ;;  %p448_p8 = pnand %p280_p6, %p431_p4  ;;  %s95_s25 = int_to_ptr.hbm [resolvable:$true] %s94_s25 }
   0xe   : > { %p266_p9 = scmp.ge.s32.totalorder %s381_s9, 1  ;;  %s85_s27 = scalar_lea.sflag [#allocation3], %s84_s17 }
   0xf   : > { %s317_s28 = sshra.s32 %s95_s25, 4  ;;  %p321_p11 = pneg %p448_p8  ;;  %s318_s28 = int_to_ptr.hbm [resolvable:$true] %s317_s28 }
  0x10   : > { %s319_s29 = scalar_lea.hbm %s318_s28, 16  ;;  %s324_s3 = scalar_lea.hbm %s489_s0, 32 }
  0x11   : > { %p320_p10 = scmp.ne.s32.totalorder %s318_s28, %s319_s29  ;;  %p325_p0 = scmp.lt.s32.totalorder %s318_s28, %s489_s0 }
  0x12   : > { %p326_p1 = scmp.lt.s32.totalorder %s324_s3, %s319_s29 }
  0x13   : > { %p322_p12 = pnand %p321_p11, %p320_p10 }
  0x14   : > { %p327_p2 = por %p326_p1, %p325_p0 }
  0x15   : > { %p323_p13 = pneg %p322_p12 }
  0x17   : > { %p328_p3 = pnand %p327_p2, %p323_p13 }
  0x19   : > { %331 = shalt.err (!%p328_p3)
}
  0x1a   : > { %s383_s6 = smov 128   ;;  %s384_s12 = smov 8  }
  0x1b   : > { %279 = dma.hbm_to_vmem [thread:$0]  (!%p448_p8), %s95_s25, 256, %s97_s24, %s85_s27, %s383_s6, %s383_s6, %s384_s12  }
  0x1c   : > { %p104_p4 = scmp.lt.s32.totalorder %s381_s9, 3 }
  0x1e   : > { %p105_p5 = pnand %p266_p9, %p104_p4 }
  0x1f   : > { %s110_s13 = sand.u32 (!%p105_p5), 1, %s373_s7  }
  0x20   : > { %108 = sbr.rel (%p105_p5) target bundleno = 178 (0xb2), region = 24  ;;  %s267_s15 = sshll.u32 (!%p105_p5), %s110_s13, 4 }
  0x21   : > { %s111_s17 = scalar_lea.sflag (!%p105_p5), [#allocation3], %s110_s13  ;;  %s114_s18 = scalar_lea.vmem (!%p105_p5), [#allocation2], %s267_s15 }
  0x25   : > { %364 = dma.done.wait (%p437_p7), %s111_s17, 256  }
  0x26   : > { %366 = vsyncadd (%p437_p7), %s111_s17, 4294967040  ;;  %v141_v0 = vld [vmem:[%s114_s18] sm:$0xff]  ;;  %s385_s19 = smov 127   ;;  %v140_v4 = vld [vmem:[%s114_s18 + $0x9] sm:$0x3f]  ;;  %s386_s9 = smov 126  }
  0x27   : > { %v139_v1 = vld [vmem:[%s114_s18 + $0x1] sm:$0xff]  ;;  %145 = vrot.lane.b32.xlu0 %v141_v0, %s385_s19  ;;  %v154_v6 = vmul.f32 -4.0, %v140_v4  ;;  %v166_v7 = vld [vmem:[%s114_s18 + $0xa] sm:$0x3f]  ;;  %p134_p6 = scmp.lt.s32.totalorder %s416_s10, 1  ;;  %vm189_vm0 = vcmask 113664  }
  0x28   : > { %v153_v2 = vmul.f32 -4.0, %v139_v1  ;;  %v165_v3 = vld [vmem:[%s114_s18 + $0x2] sm:$0xff]  ;;  %vm191_vm1 = vcmask 111616  }
  0x29   : > { %169 = vrot.lane.b32.xlu2 %v165_v3, %s385_s19  ;;  %v142_v5 = vld [vmem:[%s114_s18 + $0x8] sm:$0x3f]  ;;  %s499_s10 = smov (!%p134_p6, %s416_s10), 1 }
  0x2a   : > { %157 = vrot.lane.b32.xlu1 %v153_v2, %s385_s19  ;;  %s273_s16 = sshll.u32 %s499_s10, 4 }
  0x2b   : > { %s138_s22 = scalar_lea.vmem %s490_s1, %s273_s16 }
  0x2f   : > { %147 = vrot.lane.b32.xlu0 %v142_v5, %s385_s19 }
  0x31   : > { %171 = vrot.lane.b32.xlu2 %v166_v7, %s385_s19 }
  0x32   : > { %159 = vrot.lane.b32.xlu1 %v154_v6, %s385_s19 }
  0x37   : > { %179 = vrot.lane.b32.xlu0 %v139_v1, %s386_s9 }
  0x3a   : > { %181 = vrot.lane.b32.xlu1 %v140_v4, %s386_s9 }
  0x83   : > { %v170_v10 = vpop.permute.xlu2 %169 }
  0x8b   : > { %v172_v17 = vpop.permute.xlu2 %171 }
  0x99   : > { %v146_v8 = vpop.permute.xlu0 %145 }
  0x9a   : > { %v151_v11 = vadd.f32 %v146_v8, %v139_v1 }
  0x9c   : > { %v158_v9 = vpop.permute.xlu1 %157 }
  0x9d   : > { %v163_v15 = vadd.f32 %v158_v9, %v151_v11 }
  0x9f   : > { %v175_v18 = vadd.f32 %v170_v10, %v163_v15 }
  0xa1   : > { %v148_v12 = vpop.permute.xlu0 %147 }
  0xa2   : > { %v152_v13 = vadd.f32 %v148_v12, %v140_v4 }
  0xa4   : > { %v160_v14 = vpop.permute.xlu1 %159 }
  0xa5   : > { %v164_v16 = vadd.f32 %v160_v14, %v152_v13 }
  0xa7   : > { %v176_v20 = vadd.f32 %v172_v17, %v164_v16 }
  0xa9   : > { %v180_v19 = vpop.permute.xlu0 %179 }
  0xaa   : > { %v185_v21 = vadd.f32 %v180_v19, %v175_v18 }
  0xac   : > { %v182_v22 = vpop.permute.xlu1 %181  ;;  %v187_v23 = vmul.f32 100.0, %v185_v21 }
  0xad   : > { %v186_v24 = vadd.f32 %v182_v22, %v176_v20 }
  0xae   : > { %190 = vst.msk [vmem:[%s138_s22] sm:$0xff] %vm189_vm0, %v187_v23 }
  0xaf   : > { %v188_v25 = vmul.f32 100.0, %v186_v24 }
  0xb1   : > { %192 = vst.msk [vmem:[%s138_s22 + $0x8] sm:$0x3f] %vm191_vm1, %v188_v25 }
  0xb2 PF: > { %p11_p7 = scmp.ge.s32.totalorder %s419_s11, 4   ;;  %s494_s6 = smov %s373_s7 }
  0xb3   : > { %s495_s7 = smov %s377_s8  ;;  %s496_s8 = smov %s429_s14 }
  0xb4   : > { %s497_s9 = smov %s419_s11  ;;  %13 = sbr.rel (!%p11_p7) target bundleno = 3 (0x3), region = 64 }
  0xb9   :  { %214 = vsyncpa [#allocation3], 1 }
  0xba   :  { %216 = vsyncpa [#allocation3 + $0x1], 1 }

</bundles_post_ra>
